<compile_context>
chip_gen: v6e
topology: v6e:2x2x1
jax: 0.10.0
libtpu: 0.0.40
codegen_flags: <defaults>
</compile_context>

<pallas_src>
import functools

import jax
import jax.numpy as jnp
from jax.experimental import pallas as pl
from jax.experimental.pallas import tpu as pltpu


def _round_up(x, m):
    return (x + m - 1) // m * m


def _pick_group_size(N, L_img, lane_cap=2048):
    """Largest divisor NB of N with NB * L_img <= lane_cap lanes per grid step.

    Bigger NB amortizes per-grid-step overhead and widens the matmul lane dim
    (hits 256-alignment on v6e/v7x); the cap keeps per-step blocks / col scratch
    modest and, for larger N, leaves >= 2 grid steps for megacore / dual-TC.
    """
    best = 1
    for nb in range(1, N + 1):
        if N % nb == 0 and nb * L_img <= lane_cap:
            best = nb
    return best


def _pick_vmem_limit(block_bytes):
    """Per-generation VMEM limit: scale with the actual blocks, keep headroom.

    v5e/v6e have 128 MiB VMEM, v7x only 64 MiB -- don't hard-code 32 MiB on the
    big parts and don't over-ask on v7x.
    """
    try:
        cap = int(pltpu.get_tpu_info().vmem_capacity_bytes)
    except Exception:
        cap = 64 * 1024 * 1024          # v7x-safe fallback
    budget = (3 * cap) // 4             # leave room for compiler scratch
    want = max(32 * 1024 * 1024, 4 * block_bytes)   # blocks are double-buffered
    return min(budget, want)


def _conv_kernel(x_ref, w_ref, o_ref, col_ref, *, K, Wp, L_img, NB):
    # x_ref:   (1, Cin, Lx)        bf16; NB zero-padded flattened images stacked
    #                              on lanes (image b at [b*L_img, (b+1)*L_img)),
    #                              plus a zero tail covering the max tap shift.
    # w_ref:   (Cout, K*K*Cin)     bf16 weight slab, row order (kh, kw, cin).
    # o_ref:   (1, Cout, NB*L_img) lane-dense output (image b at [b*L_img, ...)).
    # col_ref: (K*K*Cin, NB*L_img) bf16 im2col scratch.
    Cin = x_ref.shape[1]
    Ltot = NB * L_img

    # im2col: tap (kh, kw) is ONE contiguous lane slice at static offset
    # kh*Wp + kw for the whole image group; columns where q + shift crosses an
    # image boundary are garbage that only lands in the discarded wrap/tail
    # output columns (sliced away in the wrapper).
    for kh in range(K):
        for kw in range(K):
            t = kh * K + kw
            shift = kh * Wp + kw
            col_ref[t * Cin:(t + 1) * Cin, :] = x_ref[0, :, shift:shift + Ltot]

    # One fused MXU matmul per grid step: bf16 operands, f32 accumulation.
    acc = jnp.dot(w_ref[...], col_ref[...], preferred_element_type=jnp.float32)
    o_ref[0, :, :] = acc.astype(o_ref.dtype)


def all_conv2d(x_nchw, weight_oihw, stride=1, padding=1, out_dtype=None):
    """Pallas equivalent of F.conv2d(x, weight, bias=None, stride=1, padding).

    Note: operands are rounded to bf16 (native MXU path) with f32 accumulation;
    __main__ checks against both a bf16-operand and a full-f32 reference.
    """
    assert stride == 1, "TODO(synk): only stride=1 (the module default) is implemented"
    N, Cin, H, W = x_nchw.shape
    Cout, Cin_w, K, K2 = weight_oihw.shape
    assert Cin == Cin_w and K == K2
    out_dtype = x_nchw.dtype if out_dtype is None else out_dtype

    Hp, Wp = H + 2 * padding, W + 2 * padding
    OH, OW = Hp - K + 1, Wp - K + 1
    assert OH >= 1 and OW >= 1

    # Per-image flat length on the lane axis, 128-aligned so per-image output
    # segments start on vreg boundaries (fully unmasked stores).
    L_img = _round_up(Hp * Wp, 128)
    max_shift = (K - 1) * (Wp + 1)
    KKC = K * K * Cin

    NB = _pick_group_size(N, L_img)
    G = N // NB
    Ltot = NB * L_img
    Lx = _round_up(Ltot + max_shift, 128)   # zero tail keeps the last tap slice in bounds

    # Glue (XLA-side): zero-pad spatially, flatten (Hp, Wp) onto lanes, cast to
    # bf16, stack NB images per group on the lane axis, add the zero tail.
    x_pad = jnp.pad(x_nchw, ((0, 0), (0, 0), (padding, padding), (padding, padding)))
    x_flat = x_pad.reshape(N, Cin, Hp * Wp).astype(jnp.bfloat16)
    x_flat = jnp.pad(x_flat, ((0, 0), (0, 0), (0, L_img - Hp * Wp)))
    x_grp = x_flat.reshape(G, NB, Cin, L_img).transpose(0, 2, 1, 3).reshape(G, Cin, Ltot)
    x_grp = jnp.pad(x_grp, ((0, 0), (0, 0), (0, Lx - Ltot)))

    # Dense 2-D weight slab with (kh, kw, cin) row order; bf16 for the MXU path.
    w2d = jnp.transpose(weight_oihw, (0, 2, 3, 1)).reshape(Cout, KKC).astype(jnp.bfloat16)

    kernel = functools.partial(_conv_kernel, K=K, Wp=Wp, L_img=L_img, NB=NB)

    out_bytes = jnp.dtype(out_dtype).itemsize
    cost = pl.CostEstimate(
        flops=2 * G * Cout * KKC * Ltot,
        transcendentals=0,
        bytes_accessed=x_grp.size * 2 + w2d.size * 2 + G * Cout * Ltot * out_bytes,
    )
    block_bytes = (Cin * Lx + Cout * KKC + KKC * Ltot) * 2 + Cout * Ltot * out_bytes

    out_grp = pl.pallas_call(
        kernel,
        out_shape=jax.ShapeDtypeStruct((G, Cout, Ltot), out_dtype),
        grid_spec=pltpu.PrefetchScalarGridSpec(
            num_scalar_prefetch=0,
            grid=(G,),
            in_specs=[
                pl.BlockSpec((1, Cin, Lx), lambda g: (g, 0, 0)),
                pl.BlockSpec((Cout, KKC), lambda g: (0, 0)),
            ],
            out_specs=pl.BlockSpec((1, Cout, Ltot), lambda g: (g, 0, 0)),
            scratch_shapes=[pltpu.VMEM((KKC, Ltot), jnp.bfloat16)],
        ),
        compiler_params=pltpu.CompilerParams(
            dimension_semantics=("parallel",),
            vmem_limit_bytes=_pick_vmem_limit(block_bytes),
        ),
        cost_estimate=cost,
    )(x_grp, w2d)

    # Ungroup lanes -> (N, Cout, L_img); keep q = oh*Wp + ow with ow < OW.
    out_flat = out_grp.reshape(G, Cout, NB, L_img).transpose(0, 2, 1, 3).reshape(N, Cout, L_img)
    out = out_flat[:, :, :OH * Wp].reshape(N, Cout, OH, Wp)[:, :, :, :OW]
    return out


if __name__ == "__main__":
    key = jax.random.PRNGKey(0)
    kx, kw = jax.random.split(key)

    # Small shapes consistent with the module: batch=2, in_channel=4,
    # out_channel=8, spatial=16, kernel_size=3, stride=1, padding=1.
    N, Cin, H, W = 2, 4, 16, 16
    Cout, K = 8, 3

    x = jax.random.normal(kx, (N, Cin, H, W), dtype=jnp.float32)
    # Deterministic stand-in for torch.randn(out_channel, in_channel, K, K).
    weight = jax.random.normal(kw, (Cout, Cin, K, K), dtype=jnp.float32)

    out = all_conv2d(x, weight, stride=1, padding=1)
    out = jax.block_until_ready(out)

    # Reference 1: identical math to the kernel (bf16-rounded operands, f32 acc).
    xq = x.astype(jnp.bfloat16).astype(jnp.float32)
    wq = weight.astype(jnp.bfloat16).astype(jnp.float32)
    ref_q = jax.lax.conv_general_dilated(
        xq, wq, window_strides=(1, 1), padding=((1, 1), (1, 1)),
        dimension_numbers=("NCHW", "OIHW", "NCHW"),
        precision=jax.lax.Precision.HIGHEST)
    # Reference 2: full-f32 conv (semantic fidelity; looser tol for bf16 operands).
    ref_f = jax.lax.conv_general_dilated(
        x, weight, window_strides=(1, 1), padding=((1, 1), (1, 1)),
        dimension_numbers=("NCHW", "OIHW", "NCHW"),
        precision=jax.lax.Precision.HIGHEST)

    assert out.shape == ref_f.shape == (N, Cout, H, W)
    assert out.dtype == ref_f.dtype
    assert jnp.allclose(out, ref_q, rtol=1e-3, atol=1e-3), "mismatch vs bf16-operand reference"
    assert jnp.allclose(out, ref_f, rtol=5e-2, atol=2e-1), "mismatch vs f32 reference"

    print("KERNEL_OK")
</pallas_src>

<mosaic_0001>
module attributes {stable_mosaic.version = 11 : i64} {
  func.func @_conv_kernel(%arg0: i32, %arg1: memref<1x4x896xbf16, #tpu.memory_space<vmem>>, %arg2: memref<8x36xbf16, #tpu.memory_space<vmem>>, %arg3: memref<1x8x768xf32, #tpu.memory_space<vmem>>, %arg4: memref<36x768xbf16, #tpu.memory_space<vmem>>) attributes {dimension_semantics = [#tpu.dimension_semantics<parallel>], iteration_bounds = array<i64: 1>, scalar_prefetch = 0 : i64, scratch_operands = 1 : i64, tpu.core_type = #tpu.core_type<tc>, window_params = [{transform_indices = @transform_0, window_bounds = array<i64: 1, 4, 896>}, {pipeline_mode = #tpu.pipeline_mode<synchronous>, transform_indices = @transform_1, window_bounds = array<i64: 8, 36>}, {transform_indices = @transform_2, window_bounds = array<i64: 1, 8, 768>}]} {
    %c0 = arith.constant 0 : index
    %c0_0 = arith.constant 0 : index
    %c0_1 = arith.constant 0 : index
    %0 = vector.load %arg1[%c0, %c0_0, %c0_1] : memref<1x4x896xbf16, #tpu.memory_space<vmem>>, vector<1x4x768xbf16>
    %1 = vector.shape_cast %0 : vector<1x4x768xbf16> to vector<4x768xbf16>
    %c0_2 = arith.constant 0 : index
    %c0_3 = arith.constant 0 : index
    %2 = vector.load %arg4[%c0_2, %c0_3] : memref<36x768xbf16, #tpu.memory_space<vmem>>, vector<4x768xbf16>
    tpu.vector_store %arg4[%c0_2, %c0_3], %1 {strides = array<i32>} : memref<36x768xbf16, #tpu.memory_space<vmem>>, vector<4x768xbf16>,
    %c0_4 = arith.constant 0 : index
    %c0_5 = arith.constant 0 : index
    %c1 = arith.constant 1 : index
    %3 = vector.load %arg1[%c0_4, %c0_5, %c1] : memref<1x4x896xbf16, #tpu.memory_space<vmem>>, vector<1x4x768xbf16>
    %4 = vector.shape_cast %3 : vector<1x4x768xbf16> to vector<4x768xbf16>
    %c4 = arith.constant 4 : index
    %c0_6 = arith.constant 0 : index
    %5 = vector.load %arg4[%c4, %c0_6] : memref<36x768xbf16, #tpu.memory_space<vmem>>, vector<4x768xbf16>
    tpu.vector_store %arg4[%c4, %c0_6], %4 {strides = array<i32>} : memref<36x768xbf16, #tpu.memory_space<vmem>>, vector<4x768xbf16>,
    %c0_7 = arith.constant 0 : index
    %c0_8 = arith.constant 0 : index
    %c2 = arith.constant 2 : index
    %6 = vector.load %arg1[%c0_7, %c0_8, %c2] : memref<1x4x896xbf16, #tpu.memory_space<vmem>>, vector<1x4x768xbf16>
    %7 = vector.shape_cast %6 : vector<1x4x768xbf16> to vector<4x768xbf16>
    %c8 = arith.constant 8 : index
    %c0_9 = arith.constant 0 : index
    %8 = vector.load %arg4[%c8, %c0_9] : memref<36x768xbf16, #tpu.memory_space<vmem>>, vector<4x768xbf16>
    tpu.vector_store %arg4[%c8, %c0_9], %7 {strides = array<i32>} : memref<36x768xbf16, #tpu.memory_space<vmem>>, vector<4x768xbf16>,
    %c0_10 = arith.constant 0 : index
    %c0_11 = arith.constant 0 : index
    %c18 = arith.constant 18 : index
    %9 = vector.load %arg1[%c0_10, %c0_11, %c18] : memref<1x4x896xbf16, #tpu.memory_space<vmem>>, vector<1x4x768xbf16>
    %10 = vector.shape_cast %9 : vector<1x4x768xbf16> to vector<4x768xbf16>
    %c12 = arith.constant 12 : index
    %c0_12 = arith.constant 0 : index
    %11 = vector.load %arg4[%c12, %c0_12] : memref<36x768xbf16, #tpu.memory_space<vmem>>, vector<4x768xbf16>
    tpu.vector_store %arg4[%c12, %c0_12], %10 {strides = array<i32>} : memref<36x768xbf16, #tpu.memory_space<vmem>>, vector<4x768xbf16>,
    %c0_13 = arith.constant 0 : index
    %c0_14 = arith.constant 0 : index
    %c19 = arith.constant 19 : index
    %12 = vector.load %arg1[%c0_13, %c0_14, %c19] : memref<1x4x896xbf16, #tpu.memory_space<vmem>>, vector<1x4x768xbf16>
    %13 = vector.shape_cast %12 : vector<1x4x768xbf16> to vector<4x768xbf16>
    %c16 = arith.constant 16 : index
    %c0_15 = arith.constant 0 : index
    %14 = vector.load %arg4[%c16, %c0_15] : memref<36x768xbf16, #tpu.memory_space<vmem>>, vector<4x768xbf16>
    tpu.vector_store %arg4[%c16, %c0_15], %13 {strides = array<i32>} : memref<36x768xbf16, #tpu.memory_space<vmem>>, vector<4x768xbf16>,
    %c0_16 = arith.constant 0 : index
    %c0_17 = arith.constant 0 : index
    %c20 = arith.constant 20 : index
    %15 = vector.load %arg1[%c0_16, %c0_17, %c20] : memref<1x4x896xbf16, #tpu.memory_space<vmem>>, vector<1x4x768xbf16>
    %16 = vector.shape_cast %15 : vector<1x4x768xbf16> to vector<4x768xbf16>
    %c20_18 = arith.constant 20 : index
    %c0_19 = arith.constant 0 : index
    %17 = vector.load %arg4[%c20_18, %c0_19] : memref<36x768xbf16, #tpu.memory_space<vmem>>, vector<4x768xbf16>
    tpu.vector_store %arg4[%c20_18, %c0_19], %16 {strides = array<i32>} : memref<36x768xbf16, #tpu.memory_space<vmem>>, vector<4x768xbf16>,
    %c0_20 = arith.constant 0 : index
    %c0_21 = arith.constant 0 : index
    %c36 = arith.constant 36 : index
    %18 = vector.load %arg1[%c0_20, %c0_21, %c36] : memref<1x4x896xbf16, #tpu.memory_space<vmem>>, vector<1x4x768xbf16>
    %19 = vector.shape_cast %18 : vector<1x4x768xbf16> to vector<4x768xbf16>
    %c24 = arith.constant 24 : index
    %c0_22 = arith.constant 0 : index
    %20 = vector.load %arg4[%c24, %c0_22] : memref<36x768xbf16, #tpu.memory_space<vmem>>, vector<4x768xbf16>
    tpu.vector_store %arg4[%c24, %c0_22], %19 {strides = array<i32>} : memref<36x768xbf16, #tpu.memory_space<vmem>>, vector<4x768xbf16>,
    %c0_23 = arith.constant 0 : index
    %c0_24 = arith.constant 0 : index
    %c37 = arith.constant 37 : index
    %21 = vector.load %arg1[%c0_23, %c0_24, %c37] : memref<1x4x896xbf16, #tpu.memory_space<vmem>>, vector<1x4x768xbf16>
    %22 = vector.shape_cast %21 : vector<1x4x768xbf16> to vector<4x768xbf16>
    %c28 = arith.constant 28 : index
    %c0_25 = arith.constant 0 : index
    %23 = vector.load %arg4[%c28, %c0_25] : memref<36x768xbf16, #tpu.memory_space<vmem>>, vector<4x768xbf16>
    tpu.vector_store %arg4[%c28, %c0_25], %22 {strides = array<i32>} : memref<36x768xbf16, #tpu.memory_space<vmem>>, vector<4x768xbf16>,
    %c0_26 = arith.constant 0 : index
    %c0_27 = arith.constant 0 : index
    %c38 = arith.constant 38 : index
    %24 = vector.load %arg1[%c0_26, %c0_27, %c38] : memref<1x4x896xbf16, #tpu.memory_space<vmem>>, vector<1x4x768xbf16>
    %25 = vector.shape_cast %24 : vector<1x4x768xbf16> to vector<4x768xbf16>
    %c32 = arith.constant 32 : index
    %c0_28 = arith.constant 0 : index
    %26 = vector.load %arg4[%c32, %c0_28] : memref<36x768xbf16, #tpu.memory_space<vmem>>, vector<4x768xbf16>
    tpu.vector_store %arg4[%c32, %c0_28], %25 {strides = array<i32>} : memref<36x768xbf16, #tpu.memory_space<vmem>>, vector<4x768xbf16>,
    %c0_29 = arith.constant 0 : index
    %c0_30 = arith.constant 0 : index
    %27 = vector.load %arg2[%c0_29, %c0_30] : memref<8x36xbf16, #tpu.memory_space<vmem>>, vector<8x36xbf16>
    %c0_31 = arith.constant 0 : index
    %c0_32 = arith.constant 0 : index
    %28 = vector.load %arg4[%c0_31, %c0_32] : memref<36x768xbf16, #tpu.memory_space<vmem>>, vector<36x768xbf16>
    %cst = arith.constant dense<0.000000e+00> : vector<8x768xf32>
    %29 = tpu.matmul %27, %28, %cst {dimension_numbers = #tpu.dot_dimension_numbers<[1], [0], [0], [1], [0, 0, 1, 1], [], []>} : vector<8x36xbf16>, vector<36x768xbf16>, vector<8x768xf32> -> vector<8x768xf32>
    %c0_33 = arith.constant 0 : index
    %c0_34 = arith.constant 0 : index
    %c0_35 = arith.constant 0 : index
    %30 = vector.load %arg3[%c0_33, %c0_34, %c0_35] : memref<1x8x768xf32, #tpu.memory_space<vmem>>, vector<1x8x768xf32>
    %31 = vector.shape_cast %30 : vector<1x8x768xf32> to vector<8x768xf32>
    %32 = vector.shape_cast %29 : vector<8x768xf32> to vector<1x8x768xf32>
    tpu.vector_store %arg3[%c0_33, %c0_34, %c0_35], %32 {strides = array<i32>} : memref<1x8x768xf32, #tpu.memory_space<vmem>>, vector<1x8x768xf32>,
    return
  }
  func.func @transform_0(%arg0: i32) -> (i32, i32, i32) {
    %c0_i32 = arith.constant 0 : i32
    %c0_i32_0 = arith.constant 0 : i32
    %c0_i32_1 = arith.constant 0 : i32
    return %arg0, %c0_i32, %c0_i32_0 : i32, i32, i32
  }
  func.func @transform_1(%arg0: i32) -> (i32, i32) {
    %c0_i32 = arith.constant 0 : i32
    %c0_i32_0 = arith.constant 0 : i32
    %c0_i32_1 = arith.constant 0 : i32
    return %c0_i32, %c0_i32_0 : i32, i32
  }
  func.func @transform_2(%arg0: i32) -> (i32, i32, i32) {
    %c0_i32 = arith.constant 0 : i32
    %c0_i32_0 = arith.constant 0 : i32
    %c0_i32_1 = arith.constant 0 : i32
    return %arg0, %c0_i32, %c0_i32_0 : i32, i32, i32
  }
}

</mosaic_0001>

<bundles_post_ra>
// kernel: tpu_custom_call.1
= control target key start
LH: loop header
LB: loop body
LE: loop exit
PB: predicated region body
PF: predicated region fallthrough
CT: control target
= control target key end

     0   :  { %7 = vsyncpa [#allocation4], 0  ;;  %s1160_s0 = inlined_call_operand.hbm [shape: bf16[1,4,896], index: 0, kind: input, shape index: {}]   ;;  %s1161_s1 = inlined_call_operand.hbm [shape: bf16[8,36], index: 1, kind: input, shape index: {}]   ;;  %s1162_s2 = inlined_call_operand.hbm [shape: f32[1,8,768], index: 2, kind: output, shape index: {}]  }
   0x1   :  { %8 = vsyncpa [#allocation7], 0 }
   0x2   :  { %9 = vsyncpa [#allocation5], 0  ;;  %s941_s9 = smov [#allocation3]   ;;  %s942_s11 = smov [#allocation6]  }
   0x3   :  { %s16_s10 = sshll.u32 %s941_s9, 4  ;;  %s26_s12 = sshll.u32 %s942_s11, 4  ;;  %s17_s10 = int_to_ptr.vmem [resolvable:$true] %s16_s10  ;;  %s27_s12 = int_to_ptr.vmem [resolvable:$true] %s26_s12 }
   0x4   :  { %s883_s13 = scalar_lea.vmem %s17_s10, 224  ;;  %p888_p1 = scmp.lt.s32.totalorder %s17_s10, %s17_s10 }
   0x5   :  { %p884_p0 = scmp.ne.s32.totalorder %s17_s10, %s883_s13  ;;  %p889_p2 = scmp.lt.s32.totalorder %s883_s13, %s883_s13 }
   0x7   :  { %p890_p3 = por %p889_p2, %p888_p1 }
   0x9   :  { %p891_p4 = pnand %p890_p3, %p884_p0 }
   0xb   :  { %894 = shalt.err (!%p891_p4)
}
   0xc   :  { %19 = dma.hbm_to_vmem [thread:$0]  %s1160_s0, 224, %s17_s10, [#allocation4]  }
   0xd   :  { %s903_s16 = scalar_lea.vmem %s27_s12, 64  ;;  %p908_p6 = scmp.lt.s32.totalorder %s27_s12, %s27_s12 }
   0xe   :  { %p904_p5 = scmp.ne.s32.totalorder %s27_s12, %s903_s16  ;;  %p909_p7 = scmp.lt.s32.totalorder %s903_s16, %s903_s16 }
  0x10   :  { %p910_p8 = por %p909_p7, %p908_p6 }
  0x12   :  { %p911_p9 = pnand %p910_p8, %p904_p5 }
  0x14   :  { %914 = shalt.err (!%p911_p9)
}
  0x15   :  { %29 = dma.hbm_to_vmem [thread:$0]  %s1161_s1, 64, %s27_s12, [#allocation7]  }
  0x16   :  { %935 = dma.done.wait [#allocation4], 224  }
  0x17   :  { %936 = vsyncadd [#allocation4], 4294967072 }
  0x18   :  { %937 = dma.done.wait [#allocation7], 64  }
  0x19   :  { %938 = vsyncadd [#allocation7], 4294967232  ;;  %v77_v0 = vlaneseq  ;;  %v943_v1 = vmov 1983009808   ;;  %v483_v6 = vld [vmem:[#allocation3] sm:$0xff]  ;;  %s944_s0 = smov 90  }
  0x1a   :  { %v75_v2 = vunpack.c.l.s4 %v943_v1  ;;  %v487_v8 = vcombine.high %v483_v6, %v483_v6  ;;  %802 = vst.sshfl [vmem:[#allocation2] sm:$0xf pattern:$0x76325410] %v483_v6  ;;  %s945_s1 = smov 109   ;;  %s946_s19 = smov 92   ;;  %v310_v10 = vcombine.low %v483_v6, %v483_v6 }
  0x1b   :  { %v78_v3 = vshrl.u32 %v77_v0, 7  ;;  %s947_s20 = smov 108   ;;  %s948_s21 = smov 91   ;;  %v484_v12 = vld [vmem:[#allocation3 + $0x8] sm:$0x3f]  ;;  %v952_v23 = vmov 0  }
  0x1c   :  { %v76_v4 = vunpack.c.0.s8 %v75_v2  ;;  %803 = vst.sshfl [vmem:[#allocation2 + $0x8] sm:$0xf pattern:$0x76325410] %v487_v8  ;;  %s949_s22 = smov 127   ;;  %s950_s23 = smov 126   ;;  %v502_v13 = vcombine.high %v484_v12, %v484_v12  ;;  %688 = vmatprep.mubr.bf16.mxu0 %v952_v23  ;;  %729 = vmatprep.mubr.bf16.mxu1 %v952_v23 }
  0x1d   :  { %v248_v14 = vld [vmem:[#allocation3 + $0x8] sm:$0x3f]  ;;  %s951_s24 = smov 110   ;;  %vm115_vm0 = vcmask 1043456   ;;  %vm530_vm1 = vcmask 736256   ;;  %vm294_vm2 = vcmask 891904  }
  0x1e   :  { %v975_v5 = vsub.s32 %v76_v4, %v78_v3  ;;  %v266_v17 = vcombine.high %v248_v14, %v248_v14  ;;  %v307_v18 = vld [vmem:[#allocation3 + $0x8] sm:$0x3f]  ;;  %vm353_vm3 = vcmask 883712   ;;  %vm412_vm4 = vcmask 752640   ;;  %s953_s25 = smov [#allocation8]  }
  0x1f   :  { %v325_v21 = vcombine.low %v307_v18, %v307_v18  ;;  %v366_v22 = vld [vmem:[#allocation3 + $0x8] sm:$0x3f]  ;;  %vm471_vm5 = vcmask 744448   ;;  %vm117_vm6 = vcmask 1039360   ;;  %vm637_vm7 = vcmask 1041408   ;;  %s791_s26 = sshll.u32 %s953_s25, 4  ;;  %s792_s26 = int_to_ptr.vmem [resolvable:$true] %s791_s26 }
  0x20   :  { %v494_v7 = vrot.slane %v483_v6, %v975_v5  ;;  %v501_v9 = vrot.slane %v487_v8, %v975_v5  ;;  %v317_v11 = vrot.slane %v310_v10, %v975_v5  ;;  %v516_v15 = vrot.slane %v502_v13, %v975_v5  ;;  %v425_v27 = vld [vmem:[#allocation3 + $0x8] sm:$0x3f]  ;;  %s915_s27 = scalar_lea.vmem %s792_s26, 768  ;;  %p920_p11 = scmp.lt.s32.totalorder %s792_s26, %s792_s26 }
  0x21   :  { %v509_v16 = vrot.slane %v484_v12, %v975_v5  ;;  %v280_v19 = vrot.slane %v266_v17, %v975_v5  ;;  %v273_v20 = vrot.slane %v248_v14, %v975_v5  ;;  %v339_v24 = vrot.slane %v307_v18, %v975_v5  ;;  %v70_v31 = vld [vmem:[#allocation3 + $0x8] sm:$0x3f]  ;;  %p916_p10 = scmp.ne.s32.totalorder %s792_s26, %s915_s27  ;;  %p921_p12 = scmp.lt.s32.totalorder %s915_s27, %s915_s27 }
  0x22   :  { %517 = vrot.lane.b32.xlu0 %v494_v7, %s944_s0  ;;  %281 = vrot.lane.b32.xlu1 %v494_v7, %s945_s1  ;;  %v332_v25 = vrot.slane %v325_v21, %v975_v5  ;;  %v384_v26 = vcombine.high %v366_v22, %v366_v22  ;;  %v391_v29 = vrot.slane %v366_v22, %v975_v5  ;;  %v801_v35 = vld.sshfl [vmem:[#allocation3 + $0x8] sm:$0x33 pattern:$0x76325410]  ;;  %vm176_vm8 = vcmask 1031168  }
  0x23   :  { %v443_v30 = vcombine.low %v425_v27, %v425_v27  ;;  %v457_v32 = vrot.slane %v425_v27, %v975_v5  ;;  %v88_v34 = vcombine.low %v70_v31, %v70_v31  ;;  %v130_v36 = vld [vmem:[#allocation3 + $0x8] sm:$0x3f]  ;;  %68 = vst [vmem:[#allocation2 + $0x10] sm:$0x33] %v801_v35  ;;  %v102_v37 = vrot.slane %v70_v31, %v975_v5  ;;  %p922_p13 = por %p921_p12, %p920_p11 }
  0x24   :  { %v398_v28 = vrot.slane %v384_v26, %v975_v5  ;;  %v148_v39 = vcombine.high %v130_v36, %v130_v36  ;;  %v189_v40 = vld [vmem:[#allocation3 + $0x8] sm:$0x3f]  ;;  %v155_v42 = vrot.slane %v130_v36, %v975_v5  ;;  %vm235_vm9 = vcmask 900096  }
  0x25   :  { %v450_v33 = vrot.slane %v443_v30, %v975_v5  ;;  %v95_v38 = vrot.slane %v88_v34, %v975_v5  ;;  %v207_v43 = vcombine.low %v189_v40, %v189_v40  ;;  %v221_v44 = vrot.slane %v189_v40, %v975_v5  ;;  %p923_p0 = pnand %p922_p13, %p916_p10 }
  0x26   :  { %399 = vrot.lane.b32.xlu0 %v494_v7, %s946_s19  ;;  %342 = vrot.lane.b32.xlu1 %v494_v7, %s947_s20  ;;  %v162_v41 = vrot.slane %v148_v39, %v975_v5  ;;  %vm633_vm10 = vcmask 293888  }
  0x27   :  { %v214_v45 = vrot.slane %v207_v43, %v975_v5 }
  0x2a   :  { %519 = vrot.lane.b32.xlu0 %v501_v9, %s944_s0  ;;  %283 = vrot.lane.b32.xlu1 %v501_v9, %s945_s1 }
  0x2e   :  { %340 = vrot.lane.b32.xlu0 %v317_v11, %s947_s20  ;;  %401 = vrot.lane.b32.xlu1 %v501_v9, %s946_s19 }
  0x32   :  { %458 = vrot.lane.b32.xlu0 %v317_v11, %s948_s21  ;;  %460 = vrot.lane.b32.xlu1 %v494_v7, %s948_s21 }
  0x36   :  { %105 = vrot.lane.b32.xlu1 %v494_v7, %s949_s22  ;;  %103 = vrot.lane.b32.xlu0 %v317_v11, %s949_s22 }
  0x3a   :  { %165 = vrot.lane.b32.xlu1 %v501_v9, %s950_s23  ;;  %163 = vrot.lane.b32.xlu0 %v494_v7, %s950_s23 }
  0x3e   :  { %224 = vrot.lane.b32.xlu1 %v494_v7, %s951_s24  ;;  %222 = vrot.lane.b32.xlu0 %v317_v11, %s951_s24 }
  0x42   :  { %523 = vrot.lane.b32.xlu1 %v516_v15, %s944_s0  ;;  %521 = vrot.lane.b32.xlu0 %v509_v16, %s944_s0 }
  0x46   :  { %287 = vrot.lane.b32.xlu1 %v280_v19, %s945_s1  ;;  %285 = vrot.lane.b32.xlu0 %v273_v20, %s945_s1 }
  0x4a   :  { %346 = vrot.lane.b32.xlu1 %v339_v24, %s947_s20  ;;  %344 = vrot.lane.b32.xlu0 %v332_v25, %s947_s20 }
  0x4e   :  { %405 = vrot.lane.b32.xlu1 %v398_v28, %s946_s19  ;;  %403 = vrot.lane.b32.xlu0 %v391_v29, %s946_s19 }
  0x52   :  { %464 = vrot.lane.b32.xlu1 %v457_v32, %s948_s21  ;;  %462 = vrot.lane.b32.xlu0 %v450_v33, %s948_s21 }
  0x56   :  { %109 = vrot.lane.b32.xlu1 %v102_v37, %s949_s22  ;;  %107 = vrot.lane.b32.xlu0 %v95_v38, %s949_s22 }
  0x5a   :  { %169 = vrot.lane.b32.xlu1 %v162_v41, %s950_s23  ;;  %167 = vrot.lane.b32.xlu0 %v155_v42, %s950_s23 }
  0x5e   :  { %228 = vrot.lane.b32.xlu1 %v221_v44, %s951_s24  ;;  %226 = vrot.lane.b32.xlu0 %v214_v45, %s951_s24 }
  0x94   :  { %v518_v46 = vpop.permute.xlu0 %517  ;;  %v282_v47 = vpop.permute.xlu1 %281 }
  0x95   :  { %v525_v52 = vrot.slane %v518_v46, 4  ;;  %v289_v53 = vrot.slane %v282_v47, 4 }
  0x98   :  { %v400_v48 = vpop.permute.xlu0 %399  ;;  %v1030_v49 = vpop.permute.xlu1 %342 }
  0x99   :  { %v407_v62 = vrot.slane %v400_v48, 4  ;;  %v349_v63 = vrot.slane %v1030_v49, 4 }
  0x9c   :  { %v1032_v50 = vpop.permute.xlu0 %519  ;;  %v1034_v51 = vpop.permute.xlu1 %283 }
  0x9d   :  { %v526_v54 = vrot.slane %v1032_v50, 4  ;;  %v290_v55 = vrot.slane %v1034_v51, 4 }
  0x9f   :  { %v529_v56 = vsel %vm115_vm0, %v525_v52, %v526_v54  ;;  %v293_v57 = vsel %vm115_vm0, %v289_v53, %v290_v55 }
  0xa0   :  { %v531_v58 = vsel %vm530_vm1, %v518_v46, %v529_v56  ;;  %v295_v59 = vsel %vm294_vm2, %v282_v47, %v293_v57  ;;  %v341_v60 = vpop.permute.xlu0 %340  ;;  %v1046_v61 = vpop.permute.xlu1 %401 }
  0xa1   :  { %539 = vst [vmem:[#allocation2 + $0x60] sm:$0x33] %v531_v58  ;;  %303 = vst [vmem:[#allocation2 + $0x30] sm:$0x33] %v295_v59  ;;  %v348_v0 = vrot.slane %v341_v60, 4  ;;  %v408_v1 = vrot.slane %v1046_v61, 4 }
  0xa3   :  { %v352_v2 = vsel %vm115_vm0, %v348_v0, %v349_v63  ;;  %v411_v3 = vsel %vm115_vm0, %v407_v62, %v408_v1 }
  0xa4   :  { %v354_v4 = vsel %vm353_vm3, %v341_v60, %v352_v2  ;;  %v413_v5 = vsel %vm412_vm4, %v400_v48, %v411_v3  ;;  %v459_v6 = vpop.permute.xlu0 %458  ;;  %v1058_v7 = vpop.permute.xlu1 %460  ;;  %v1106_v2 = vld [vmem:[#allocation6] sm:$0xf] }
  0xa5   :  { %362 = vst [vmem:[#allocation2 + $0x30] sm:$0xcc] %v354_v4  ;;  %421 = vst [vmem:[#allocation2 + $0x48] sm:$0x33] %v413_v5  ;;  %v466_v8 = vrot.slane %v459_v6, 4  ;;  %v467_v9 = vrot.slane %v1058_v7, 4 }
  0xa7   :  { %v470_v10 = vsel %vm115_vm0, %v466_v8, %v467_v9 }
  0xa8   :  { %v472_v11 = vsel %vm471_vm5, %v459_v6, %v470_v10  ;;  %v1065_v12 = vpop.permute.xlu1 %105  ;;  %v104_v13 = vpop.permute.xlu0 %103  ;;  %v555_v14 = vld [vmem:[#allocation2 + $0x60] sm:$0x33] }
  0xa9   :  { %480 = vst [vmem:[#allocation2 + $0x48] sm:$0xcc] %v472_v11  ;;  %v112_v15 = vrot.slane %v1065_v12, 4  ;;  %v111_v16 = vrot.slane %v104_v13, 4  ;;  %v817_v17 = vcombine.high %v555_v14, %v555_v14  ;;  %v816_v18 = vcombine.low %v555_v14, %v555_v14 }
  0xab   :  { %v116_v19 = vsel %vm115_vm0, %v111_v16, %v112_v15  ;;  %822 = vmatprep.subr.msk.bf16.mxu0 %vm637_vm7, %v817_v17  ;;  %v639_v20 = vsel %vm637_vm7, %v816_v18, 0 }
  0xac   :  { %v118_v21 = vsel %vm117_vm6, %v104_v13, %v116_v19  ;;  %667 = vmatpush1.bf16.msra.mxu0 %v639_v20  ;;  %v1074_v22 = vpop.permute.xlu1 %165  ;;  %v164_v24 = vpop.permute.xlu0 %163 }
  0xad   :  { %126 = vst [vmem:[#allocation2] sm:$0xcc] %v118_v21  ;;  %v172_v25 = vrot.slane %v1074_v22, 4  ;;  %v171_v26 = vrot.slane %v164_v24, 4 }
  0xaf   :  { %v175_v27 = vsel %vm115_vm0, %v171_v26, %v172_v25 }
  0xb0   :  { %v177_v28 = vsel %vm176_vm8, %v164_v24, %v175_v27  ;;  %v1081_v29 = vpop.permute.xlu1 %224  ;;  %v223_v30 = vpop.permute.xlu0 %222  ;;  %v853_v31 = vld [vmem:[#allocation2 + $0x34] ss:$24 sps:$4 sm:$0xff]   ;;  %v855_v32 = vld [vmem:[#allocation2 + $0x30] ss:$24 sps:$4 sm:$0xff]  }
  0xb1   :  { %185 = vst [vmem:[#allocation2 + $0x18] sm:$0x33] %v177_v28  ;;  %v231_v33 = vrot.slane %v1081_v29, 4  ;;  %v230_v34 = vrot.slane %v223_v30, 4  ;;  %668 = vmatprep.subr.bf16.mxu0 %v853_v31 }
  0xb2   :  { %669 = vmatpush1.bf16.msra.mxu0 %v855_v32 }
  0xb3   :  { %v234_v35 = vsel %vm115_vm0, %v230_v34, %v231_v33 }
  0xb4   :  { %v236_v36 = vsel %vm235_vm9, %v223_v30, %v234_v35  ;;  %v524_v37 = vpop.permute.xlu1 %523  ;;  %v522_v38 = vpop.permute.xlu0 %521 }
  0xb5   :  { %244 = vst [vmem:[#allocation2 + $0x18] sm:$0xcc] %v236_v36  ;;  %v528_v39 = vrot.slane %v524_v37, 4  ;;  %v527_v40 = vrot.slane %v522_v38, 4 }
  0xb7   :  { %v532_v41 = vsel %vm115_vm0, %v526_v54, %v527_v40  ;;  %v534_v42 = vsel %vm115_vm0, %v527_v40, %v528_v39 }
  0xb8   :  { %v533_v43 = vsel %vm530_vm1, %v1032_v50, %v532_v41  ;;  %v535_v44 = vsel %vm530_vm1, %v522_v38, %v534_v42  ;;  %v288_v45 = vpop.permute.xlu1 %287  ;;  %v286_v46 = vpop.permute.xlu0 %285 }
  0xb9   :  { %540 = vst [vmem:[#allocation2 + $0x68] sm:$0x33] %v533_v43  ;;  %541 = vst [vmem:[#allocation2 + $0x70] sm:$0x33] %v535_v44  ;;  %v292_v47 = vrot.slane %v288_v45, 4  ;;  %v291_v48 = vrot.slane %v286_v46, 4 }
  0xbb   :  { %v296_v52 = vsel %vm115_vm0, %v290_v55, %v291_v48  ;;  %v298_v53 = vsel %vm115_vm0, %v291_v48, %v292_v47 }
  0xbc   :  { %v297_v54 = vsel %vm294_vm2, %v1034_v51, %v296_v52  ;;  %v299_v56 = vsel %vm294_vm2, %v286_v46, %v298_v53  ;;  %v347_v50 = vpop.permute.xlu1 %346  ;;  %v345_v57 = vpop.permute.xlu0 %344  ;;  %v856_v58 = vld [vmem:[#allocation2 + $0x4] ss:$24 sps:$4 sm:$0xff]   ;;  %v858_v59 = vld [vmem:[#allocation2] ss:$24 sps:$4 sm:$0xff]  }
  0xbd   :  { %304 = vst [vmem:[#allocation2 + $0x38] sm:$0x33] %v297_v54  ;;  %305 = vst [vmem:[#allocation2 + $0x40] sm:$0x33] %v299_v56  ;;  %v351_v60 = vrot.slane %v347_v50, 4  ;;  %v350_v62 = vrot.slane %v345_v57, 4  ;;  %670 = vmatprep.subr.bf16.mxu0 %v856_v58 }
  0xbe   :  { %671 = vmatpush1.bf16.msra.mxu0 %v858_v59 }
  0xbf   :  { %v355_v55 = vsel %vm115_vm0, %v349_v63, %v350_v62  ;;  %v357_v0 = vsel %vm115_vm0, %v350_v62, %v351_v60 }
  0xc0   :  { %v356_v51 = vsel %vm353_vm3, %v1030_v49, %v355_v55  ;;  %v358_v3 = vsel %vm353_vm3, %v345_v57, %v357_v0  ;;  %v406_v4 = vpop.permute.xlu1 %405  ;;  %v404_v5 = vpop.permute.xlu0 %403  ;;  %v556_v6 = vld [vmem:[#allocation2 + $0x68] sm:$0x33]  ;;  %v557_v8 = vld [vmem:[#allocation2 + $0x70] sm:$0x33] }
  0xc1   :  { %363 = vst [vmem:[#allocation2 + $0x38] sm:$0xcc] %v356_v51  ;;  %364 = vst [vmem:[#allocation2 + $0x40] sm:$0xcc] %v358_v3  ;;  %v410_v10 = vrot.slane %v406_v4, 4  ;;  %v409_v11 = vrot.slane %v404_v5, 4  ;;  %v819_v63 = vcombine.high %v556_v6, %v556_v6  ;;  %v821_v13 = vcombine.high %v557_v8, %v557_v8  ;;  %823 = vmatmul.mubr.msk.bf16.vlgmr.msra.gmra.mxu0 %vm633_vm10, %v1106_v2 }
  0xc2   :  { %v818_v14 = vcombine.low %v556_v6, %v556_v6  ;;  %v820_v16 = vcombine.low %v557_v8, %v557_v8  ;;  %770 = vmatprep.mubr.bf16.mxu0 %v952_v23 }
  0xc3   :  { %v414_v49 = vsel %vm115_vm0, %v408_v1, %v409_v11  ;;  %v416_v17 = vsel %vm115_vm0, %v409_v11, %v410_v10  ;;  %824 = vmatprep.subr.msk.bf16.mxu1 %vm637_vm7, %v819_v63  ;;  %826 = vmatprep.subr.msk.bf16.mxu0 %vm637_vm7, %v821_v13 }
  0xc4   :  { %v415_v18 = vsel %vm412_vm4, %v1046_v61, %v414_v49  ;;  %v417_v19 = vsel %vm412_vm4, %v404_v5, %v416_v17  ;;  %v465_v20 = vpop.permute.xlu1 %464  ;;  %v645_v21 = vsel %vm637_vm7, %v818_v14, 0  ;;  %v463_v24 = vpop.permute.xlu0 %462  ;;  %v651_v26 = vsel %vm637_vm7, %v820_v16, 0 }
  0xc5   :  { %422 = vst [vmem:[#allocation2 + $0x50] sm:$0x33] %v415_v18  ;;  %423 = vst [vmem:[#allocation2 + $0x58] sm:$0x33] %v417_v19  ;;  %v469_v1 = vrot.slane %v465_v20, 4  ;;  %708 = vmatpush1.bf16.msra.mxu1 %v645_v21  ;;  %v468_v27 = vrot.slane %v463_v24, 4  ;;  %749 = vmatpush1.bf16.msra.mxu0 %v651_v26 }
  0xc7   :  { %v473_v61 = vsel %vm115_vm0, %v467_v9, %v468_v27  ;;  %v475_v28 = vsel %vm115_vm0, %v468_v27, %v469_v1 }
  0xc8   :  { %v474_v30 = vsel %vm471_vm5, %v1058_v7, %v473_v61  ;;  %v476_v31 = vsel %vm471_vm5, %v463_v24, %v475_v28  ;;  %v110_v32 = vpop.permute.xlu1 %109  ;;  %v108_v34 = vpop.permute.xlu0 %107 }
  0xc9   :  { %481 = vst [vmem:[#allocation2 + $0x50] sm:$0xcc] %v474_v30  ;;  %482 = vst [vmem:[#allocation2 + $0x58] sm:$0xcc] %v476_v31  ;;  %v114_v23 = vrot.slane %v110_v32, 4  ;;  %v113_v35 = vrot.slane %v108_v34, 4 }
  0xcb   :  { %v119_v36 = vsel %vm115_vm0, %v112_v15, %v113_v35  ;;  %v121_v37 = vsel %vm115_vm0, %v113_v35, %v114_v23 }
  0xcc   :  { %v120_v9 = vsel %vm117_vm6, %v1065_v12, %v119_v36  ;;  %v122_v38 = vsel %vm117_vm6, %v108_v34, %v121_v37  ;;  %v170_v7 = vpop.permute.xlu1 %169  ;;  %v168_v39 = vpop.permute.xlu0 %167 }
  0xcd   :  { %127 = vst [vmem:[#allocation2 + $0x8] sm:$0xcc] %v120_v9  ;;  %128 = vst [vmem:[#allocation2 + $0x10] sm:$0xcc] %v122_v38  ;;  %v174_v40 = vrot.slane %v170_v7, 4  ;;  %v173_v41 = vrot.slane %v168_v39, 4 }
  0xcf   :  { %v178_v42 = vsel %vm115_vm0, %v172_v25, %v173_v41  ;;  %v180_v43 = vsel %vm115_vm0, %v173_v41, %v174_v40 }
  0xd0   :  { %v179_v15 = vsel %vm176_vm8, %v1074_v22, %v178_v42  ;;  %v181_v44 = vsel %vm176_vm8, %v168_v39, %v180_v43  ;;  %v229_v12 = vpop.permute.xlu1 %228  ;;  %v227_v45 = vpop.permute.xlu0 %226  ;;  %v863_v46 = vld [vmem:[#allocation2 + $0x3c] ss:$24 sps:$4 sm:$0xff]   ;;  %v865_v52 = vld [vmem:[#allocation2 + $0x40] ss:$24 sps:$4 sm:$0xff]  }
  0xd1   :  { %186 = vst [vmem:[#allocation2 + $0x20] sm:$0x33] %v179_v15  ;;  %187 = vst [vmem:[#allocation2 + $0x28] sm:$0x33] %v181_v44  ;;  %v233_v47 = vrot.slane %v229_v12, 4  ;;  %v232_v48 = vrot.slane %v227_v45, 4  ;;  %709 = vmatprep.subr.bf16.mxu1 %v863_v46 }
  0xd2   :  { %v867_v53 = vld [vmem:[#allocation2 + $0x44] ss:$24 sps:$4 sm:$0xff]   ;;  %v868_v54 = vld [vmem:[#allocation2 + $0x38] ss:$24 sps:$4 sm:$0xff]  }
  0xd3   :  { %v237_v25 = vsel %vm115_vm0, %v231_v33, %v232_v48  ;;  %v239_v56 = vsel %vm115_vm0, %v232_v48, %v233_v47  ;;  %750 = vmatprep.subr.bf16.mxu0 %v867_v53  ;;  %710 = vmatpush1.bf16.msra.mxu1 %v868_v54 }
  0xd4   :  { %v238_v22 = vsel %vm235_vm9, %v1081_v29, %v237_v25  ;;  %v240_v50 = vsel %vm235_vm9, %v227_v45, %v239_v56  ;;  %751 = vmatpush1.bf16.msra.mxu0 %v865_v52 }
  0xd5   :  { %245 = vst [vmem:[#allocation2 + $0x20] sm:$0xcc] %v238_v22  ;;  %246 = vst [vmem:[#allocation2 + $0x28] sm:$0xcc] %v240_v50 }
  0xdc   :  { %v869_v57 = vld [vmem:[#allocation2 + $0xc] ss:$24 sps:$4 sm:$0xff]   ;;  %v871_v58 = vld [vmem:[#allocation2 + $0x10] ss:$24 sps:$4 sm:$0xff]  }
  0xdd   :  { %v873_v59 = vld [vmem:[#allocation2 + $0x14] ss:$24 sps:$4 sm:$0xff]   ;;  %v874_v60 = vld [vmem:[#allocation2 + $0x8] ss:$24 sps:$4 sm:$0xff]   ;;  %711 = vmatprep.subr.bf16.mxu1 %v869_v57 }
  0xde   :  { %752 = vmatprep.subr.bf16.mxu0 %v873_v59  ;;  %712 = vmatpush1.bf16.msra.mxu1 %v874_v60 }
  0xdf   :  { %753 = vmatpush1.bf16.msra.mxu0 %v871_v58 }
  0xe1   :  { %825 = vmatmul.mubr.msk.bf16.vlgmr.msra.gmra.mxu1 %vm633_vm10, %v1106_v2 }
  0xe2   :  { %827 = vmatmul.mubr.msk.bf16.vlgmr.msra.gmra.mxu0 %vm633_vm10, %v1106_v2 }
 0x181   :  { %v690_v29 = vpop.f32.mrf.mxu0 }
 0x182   :  { %779 = vst [vmem:[#allocation8] sm:$0xff] %v690_v29 }
 0x183   :  { %v692_v33 = vpop.f32.mrf.mxu0 }
 0x184   :  { %780 = vst [vmem:[#allocation8 + $0x8] sm:$0xff] %v692_v33 }
 0x185   :  { %v694_v62 = vpop.f32.mrf.mxu0 }
 0x187   :  { %v695_v55 = vpop.f32.mrf.mxu0 }
 0x1a1   :  { %v731_v0 = vpop.f32.mrf.mxu1 }
 0x1a2   :  { %781 = vst [vmem:[#allocation8 + $0x10] sm:$0xff] %v731_v0  ;;  %v772_v51 = vpop.f32.mrf.mxu0 }
 0x1a3   :  { %783 = vst [vmem:[#allocation8 + $0x20] sm:$0xff] %v772_v51  ;;  %v733_v3 = vpop.f32.mrf.mxu1 }
 0x1a4   :  { %782 = vst [vmem:[#allocation8 + $0x18] sm:$0xff] %v733_v3  ;;  %v774_v4 = vpop.f32.mrf.mxu0 }
 0x1a5   :  { %784 = vst [vmem:[#allocation8 + $0x28] sm:$0xff] %v774_v4  ;;  %v735_v5 = vpop.f32.mrf.mxu1 }
 0x1a6   :  { %v776_v6 = vpop.f32.mrf.mxu0 }
 0x1a7   :  { %926 = shalt.err (!%p923_p0)
}
 0x1a8   :  { %794 = dma.vmem_to_hbm [thread:$0]  %s792_s26, 768, %s1162_s2, [#allocation5]   ;;  %v736_v2 = vpop.f32.mrf.mxu1  ;;  %v777_v8 = vpop.f32.mrf.mxu0 }
 0x1a9   :  { %939 = dma.done.wait [#allocation5], 768  }
 0x1aa   :  { %940 = vsyncadd [#allocation5], 4294966528 }
 0x1ab   :  { %798 = vsyncpa [#allocation4], 1 }
 0x1ac   :  { %799 = vsyncpa [#allocation7], 1 }
 0x1ad   :  { %800 = vsyncpa [#allocation5], 1 }

</bundles_post_ra>
